<compile_context>
chip_gen: v6e
topology: v6e:2x2x1
jax: 0.10.0
libtpu: 0.0.40
codegen_flags: <defaults>
</compile_context>

<pallas_src>
import functools
import math

import jax
import jax.numpy as jnp
from jax import lax
from jax.experimental import pallas as pl
from jax.experimental.pallas import tpu as pltpu


# dot_general dimension numbers: contract the LAST dim of both 2-D operands
# (i.e. a @ b.T without materializing the transpose).
_CONTRACT_LAST = (((1,), (1,)), ((), ()))


def _mha_kernel(*refs, num_heads, shared_qkv, has_mask, use_bf16_matmul):
    # Ref order: x inputs (1 if shared_qkv else 3), wqkv (3D, D), bqkv (1, 3D),
    #            [mask int8 (Bb, T, T)], out (Bb, T, D).
    n_x = 1 if shared_qkv else 3
    x_refs = refs[:n_x]
    wqkv_ref = refs[n_x]
    bqkv_ref = refs[n_x + 1]
    mask_ref = refs[n_x + 2] if has_mask else None
    o_ref = refs[-1]

    Bb, T, D = o_ref.shape
    H = num_heads
    hd = D // H
    rows = Bb * T

    cdt = jnp.bfloat16 if use_bf16_matmul else jnp.float32

    def mm_t(a, b):  # a @ b.T, f32 accumulation on the MXU
        return lax.dot_general(a.astype(cdt), b.astype(cdt), _CONTRACT_LAST,
                               preferred_element_type=jnp.float32)

    wqkv = wqkv_ref[...]          # (3D, D), torch Linear layout (out, in)
    bqkv = bqkv_ref[...]          # (1, 3D)

    if shared_qkv:
        # Self-attention: one fused projection matmul, N = 3D.
        x2 = x_refs[0][...].reshape(rows, D)
        qkv = mm_t(x2, wqkv) + bqkv                      # (rows, 3D)
        q = qkv[:, 0:D]
        k = qkv[:, D:2 * D]
        v = qkv[:, 2 * D:3 * D]
    else:
        # Cross-attention: distinct inputs, three matmuls against static
        # row-slices of the (resident) fused weight.
        xq2 = x_refs[0][...].reshape(rows, D)
        xk2 = x_refs[1][...].reshape(rows, D)
        xv2 = x_refs[2][...].reshape(rows, D)
        q = mm_t(xq2, wqkv[0:D, :]) + bqkv[:, 0:D]
        k = mm_t(xk2, wqkv[D:2 * D, :]) + bqkv[:, D:2 * D]
        v = mm_t(xv2, wqkv[2 * D:3 * D, :]) + bqkv[:, 2 * D:3 * D]

    # Fold the 1/sqrt(head_dim) score scale into q (rows x D multiply instead
    # of scaling every (T, T) score matrix).
    q = q * jnp.float32(1.0 / math.sqrt(hd))

    if has_mask:
        # Compact int8 mask -> additive bias (0 / -1e20) with one select,
        # matching masked_fill(mask == 0, -1e20) semantics.
        mf = mask_ref[...].astype(jnp.float32)           # (Bb, T, T)
        bias_all = jnp.where(mf == 0.0, jnp.float32(-1e20), jnp.float32(0.0))

    out_rows = []
    for b in range(Bb):                                   # small static loop
        r0 = b * T
        qb = q[r0:r0 + T, :]
        kb = k[r0:r0 + T, :]
        vb = v[r0:r0 + T, :]
        ohs = []
        for h in range(H):                                # small static loop
            lo = h * hd
            qh = qb[:, lo:lo + hd]
            kh = kb[:, lo:lo + hd]
            vh = vb[:, lo:lo + hd]

            s = mm_t(qh, kh)                              # (T, T) scores
            if has_mask:
                s = s + bias_all[b]

            # Numerically stable softmax with deferred normalization.
            m = jnp.max(s, axis=-1, keepdims=True)
            e = jnp.exp(s - m)
            denom = jnp.sum(e, axis=-1, keepdims=True)
            r = pl.reciprocal(denom, approx=True)         # EUP slot (free-ish)
            r = r * (2.0 - denom * r)                     # one Newton step -> f32-level accuracy

            # Dropout(p=0.1) on attention probs -> identity in eval mode.
            oh = jnp.dot(e.astype(cdt), vh.astype(cdt),
                         preferred_element_type=jnp.float32)   # (T, hd)
            ohs.append(oh * r)                            # normalize after PV

        out_rows.append(jnp.concatenate(ohs, axis=-1))    # (T, D) lane-dense
    out2d = out_rows[0] if Bb == 1 else jnp.concatenate(out_rows, axis=0)

    # Single lane-dense store of the whole (Bb, T, D) block.
    o_ref[...] = out2d.reshape(Bb, T, D).astype(o_ref.dtype)


def _pick_block_batch(B, T):
    # Aim for >= ~256 projection rows per grid step (MXU M dim), divisor of B.
    target = max(1, 256 // max(T, 1))
    bb = max(1, min(B, target))
    while B % bb:
        bb -= 1
    return bb


def _compiler_params(n_x_inputs, Bb, T, D, has_mask):
    f32 = 4
    blk_io = (n_x_inputs + 1) * Bb * T * D * f32 + (Bb * T * T if has_mask else 0)
    resident = (3 * D * D + 3 * D) * f32
    interm = Bb * T * 3 * D * f32 + (Bb + 4) * T * T * f32 + 2 * Bb * T * D * f32
    est = 2 * blk_io + 2 * resident + interm
    kwargs = dict(dimension_semantics=("parallel",))
    if est > 32 * 1024 * 1024:
        # TODO(synk): beyond this point, query-tiled flash streaming (not just a
        # bigger scoped-VMEM budget) is the right fix, especially on v7x (64 MiB).
        kwargs["vmem_limit_bytes"] = min(int(est * 1.25), 64 * 1024 * 1024)
    return pltpu.CompilerParams(**kwargs)


def multi_headed_attention(query, key, value, wq, bq, wk, bk, wv, bv,
                           num_heads, mask=None, use_bf16_matmul=False):
    """query/key/value: (B, T, D); w*: (D, D) torch Linear layout (out, in);
       b*: (D,). Returns (B, T, D), matching the PyTorch module's forward
       in eval mode (dropout = identity)."""
    B, T, D = query.shape
    assert D % num_heads == 0
    assert key.shape == (B, T, D) and value.shape == (B, T, D)

    shared = (query is key) and (key is value)
    has_mask = mask is not None
    Bb = _pick_block_batch(B, T)
    grid = (B // Bb,)

    # Fused QKV weight / bias (torch layout kept: rows are output features).
    wqkv = jnp.concatenate([wq, wk, wv], axis=0).astype(jnp.float32)     # (3D, D)
    bqkv = jnp.concatenate([bq, bk, bv], axis=0).reshape(1, 3 * D).astype(jnp.float32)

    inputs = [query] if shared else [query, key, value]
    in_specs = [pl.BlockSpec((Bb, T, D), lambda i: (i, 0, 0))
                for _ in range(len(inputs))]

    inputs += [wqkv, bqkv]
    in_specs += [pl.BlockSpec((3 * D, D), lambda i: (0, 0)),   # resident weights
                 pl.BlockSpec((1, 3 * D), lambda i: (0, 0))]   # resident bias

    if has_mask:
        # Compact int8 mask in HBM; the 0/-1e20 bias is built in-kernel.
        mask_i8 = jnp.broadcast_to(mask != 0, (B, T, T)).astype(jnp.int8)
        inputs.append(mask_i8)
        in_specs.append(pl.BlockSpec((Bb, T, T), lambda i: (i, 0, 0)))

    kernel = functools.partial(_mha_kernel, num_heads=num_heads,
                               shared_qkv=shared, has_mask=has_mask,
                               use_bf16_matmul=use_bf16_matmul)

    out = pl.pallas_call(
        kernel,
        out_shape=jax.ShapeDtypeStruct((B, T, D), jnp.float32),
        grid_spec=pltpu.PrefetchScalarGridSpec(
            num_scalar_prefetch=0,
            grid=grid,
            in_specs=in_specs,
            out_specs=pl.BlockSpec((Bb, T, D), lambda i: (i, 0, 0)),
        ),
        compiler_params=_compiler_params(len(inputs) - 2 - int(has_mask),
                                         Bb, T, D, has_mask),
    )(*inputs)
    return out


def _reference(query, key, value, wq, bq, wk, bk, wv, bv, num_heads, mask=None):
    B, T, D = query.shape
    hd = D // num_heads
    q = query @ wq.T + bq
    k = key @ wk.T + bk
    v = value @ wv.T + bv

    def split(x):
        return x.reshape(B, T, num_heads, hd).transpose(0, 2, 1, 3)

    q, k, v = split(q), split(k), split(v)
    scores = jnp.einsum("bhqd,bhkd->bhqk", q, k) / math.sqrt(hd)
    if mask is not None:
        scores = jnp.where(mask[:, None] == 0, -1e20, scores)
    probs = jax.nn.softmax(scores, axis=-1)
    out = jnp.einsum("bhqk,bhkd->bhqd", probs, v)
    return out.transpose(0, 2, 1, 3).reshape(B, T, D)


if __name__ == "__main__":
    B, T, D, H = 2, 8, 32, 4

    key0 = jax.random.PRNGKey(0)
    keys = jax.random.split(key0, 10)

    query = jax.random.normal(keys[0], (B, T, D), dtype=jnp.float32)
    key_in = jax.random.normal(keys[1], (B, T, D), dtype=jnp.float32)
    value = jax.random.normal(keys[2], (B, T, D), dtype=jnp.float32)

    # torch nn.Linear shapes: weight (out, in), bias (out,)
    scale = 1.0 / math.sqrt(D)
    wq = jax.random.uniform(keys[3], (D, D), minval=-scale, maxval=scale, dtype=jnp.float32)
    wk = jax.random.uniform(keys[4], (D, D), minval=-scale, maxval=scale, dtype=jnp.float32)
    wv = jax.random.uniform(keys[5], (D, D), minval=-scale, maxval=scale, dtype=jnp.float32)
    bq = jax.random.uniform(keys[6], (D,), minval=-scale, maxval=scale, dtype=jnp.float32)
    bk = jax.random.uniform(keys[7], (D,), minval=-scale, maxval=scale, dtype=jnp.float32)
    bv = jax.random.uniform(keys[8], (D,), minval=-scale, maxval=scale, dtype=jnp.float32)

    # Causal-style boolean mask (B, T, T); the module applies mask.unsqueeze(1) over heads.
    mask = jnp.tril(jnp.ones((T, T), dtype=jnp.float32))[None].repeat(B, axis=0)

    # 1) General path: distinct q/k/v inputs (cross-attention style) + mask.
    out1 = multi_headed_attention(query, key_in, value, wq, bq, wk, bk, wv, bv,
                                  num_heads=H, mask=mask)
    out1 = jax.block_until_ready(out1)
    ref1 = _reference(query, key_in, value, wq, bq, wk, bk, wv, bv, num_heads=H, mask=mask)
    assert out1.shape == (B, T, D)
    assert jnp.allclose(out1, ref1, atol=5e-4, rtol=5e-4), "general path mismatch vs reference"

    # 2) Self-attention path: shared input -> single fused QKV matmul, no mask.
    out2 = multi_headed_attention(query, query, query, wq, bq, wk, bk, wv, bv,
                                  num_heads=H, mask=None)
    out2 = jax.block_until_ready(out2)
    ref2 = _reference(query, query, query, wq, bq, wk, bk, wv, bv, num_heads=H, mask=None)
    assert out2.shape == (B, T, D)
    assert jnp.allclose(out2, ref2, atol=5e-4, rtol=5e-4), "shared-qkv path mismatch vs reference"

    print("KERNEL_OK")
</pallas_src>

<mosaic_0001>
module attributes {stable_mosaic.version = 11 : i64} {
  func.func @_mha_kernel(%arg0: i32, %arg1: memref<2x8x32xf32, #tpu.memory_space<vmem>>, %arg2: memref<2x8x32xf32, #tpu.memory_space<vmem>>, %arg3: memref<2x8x32xf32, #tpu.memory_space<vmem>>, %arg4: memref<96x32xf32, #tpu.memory_space<vmem>>, %arg5: memref<1x96xf32, #tpu.memory_space<vmem>>, %arg6: memref<2x8x8xi8, #tpu.memory_space<vmem>>, %arg7: memref<2x8x32xf32, #tpu.memory_space<vmem>>) attributes {dimension_semantics = [#tpu.dimension_semantics<parallel>], iteration_bounds = array<i64: 1>, scalar_prefetch = 0 : i64, scratch_operands = 0 : i64, tpu.core_type = #tpu.core_type<tc>, window_params = [{transform_indices = @transform_0, window_bounds = array<i64: 2, 8, 32>}, {transform_indices = @transform_1, window_bounds = array<i64: 2, 8, 32>}, {transform_indices = @transform_2, window_bounds = array<i64: 2, 8, 32>}, {pipeline_mode = #tpu.pipeline_mode<synchronous>, transform_indices = @transform_3, window_bounds = array<i64: 96, 32>}, {pipeline_mode = #tpu.pipeline_mode<synchronous>, transform_indices = @transform_4, window_bounds = array<i64: 1, 96>}, {transform_indices = @transform_5, window_bounds = array<i64: 2, 8, 8>}, {transform_indices = @transform_6, window_bounds = array<i64: 2, 8, 32>}]} {
    %c0 = arith.constant 0 : index
    %c0_0 = arith.constant 0 : index
    %0 = vector.load %arg4[%c0, %c0_0] : memref<96x32xf32, #tpu.memory_space<vmem>>, vector<96x32xf32>
    %c0_1 = arith.constant 0 : index
    %c0_2 = arith.constant 0 : index
    %1 = vector.load %arg5[%c0_1, %c0_2] : memref<1x96xf32, #tpu.memory_space<vmem>>, vector<1x96xf32>
    %c0_3 = arith.constant 0 : index
    %c0_4 = arith.constant 0 : index
    %c0_5 = arith.constant 0 : index
    %2 = vector.load %arg1[%c0_3, %c0_4, %c0_5] : memref<2x8x32xf32, #tpu.memory_space<vmem>>, vector<2x8x32xf32>
    %3 = vector.shape_cast %2 : vector<2x8x32xf32> to vector<16x32xf32>
    %c0_6 = arith.constant 0 : index
    %c0_7 = arith.constant 0 : index
    %c0_8 = arith.constant 0 : index
    %4 = vector.load %arg2[%c0_6, %c0_7, %c0_8] : memref<2x8x32xf32, #tpu.memory_space<vmem>>, vector<2x8x32xf32>
    %5 = vector.shape_cast %4 : vector<2x8x32xf32> to vector<16x32xf32>
    %c0_9 = arith.constant 0 : index
    %c0_10 = arith.constant 0 : index
    %c0_11 = arith.constant 0 : index
    %6 = vector.load %arg3[%c0_9, %c0_10, %c0_11] : memref<2x8x32xf32, #tpu.memory_space<vmem>>, vector<2x8x32xf32>
    %7 = vector.shape_cast %6 : vector<2x8x32xf32> to vector<16x32xf32>
    %8 = vector.extract_strided_slice %0 {offsets = [0, 0], sizes = [32, 32], strides = [1, 1]} : vector<96x32xf32> to vector<32x32xf32>
    %cst = arith.constant dense<0.000000e+00> : vector<16x32xf32>
    %9 = tpu.matmul %3, %8, %cst {dimension_numbers = #tpu.dot_dimension_numbers<[1], [1], [0], [0], [0, 0, 1, 0], [], []>} : vector<16x32xf32>, vector<32x32xf32>, vector<16x32xf32> -> vector<16x32xf32>
    %10 = vector.extract_strided_slice %1 {offsets = [0, 0], sizes = [1, 32], strides = [1, 1]} : vector<1x96xf32> to vector<1x32xf32>
    %11 = vector.broadcast %10 : vector<1x32xf32> to vector<16x32xf32>
    %12 = arith.addf %9, %11 : vector<16x32xf32>
    %13 = vector.extract_strided_slice %0 {offsets = [32, 0], sizes = [32, 32], strides = [1, 1]} : vector<96x32xf32> to vector<32x32xf32>
    %cst_12 = arith.constant dense<0.000000e+00> : vector<16x32xf32>
    %14 = tpu.matmul %5, %13, %cst_12 {dimension_numbers = #tpu.dot_dimension_numbers<[1], [1], [0], [0], [0, 0, 1, 0], [], []>} : vector<16x32xf32>, vector<32x32xf32>, vector<16x32xf32> -> vector<16x32xf32>
    %15 = vector.extract_strided_slice %1 {offsets = [0, 32], sizes = [1, 32], strides = [1, 1]} : vector<1x96xf32> to vector<1x32xf32>
    %16 = vector.broadcast %15 : vector<1x32xf32> to vector<16x32xf32>
    %17 = arith.addf %14, %16 : vector<16x32xf32>
    %18 = vector.extract_strided_slice %0 {offsets = [64, 0], sizes = [32, 32], strides = [1, 1]} : vector<96x32xf32> to vector<32x32xf32>
    %cst_13 = arith.constant dense<0.000000e+00> : vector<16x32xf32>
    %19 = tpu.matmul %7, %18, %cst_13 {dimension_numbers = #tpu.dot_dimension_numbers<[1], [1], [0], [0], [0, 0, 1, 0], [], []>} : vector<16x32xf32>, vector<32x32xf32>, vector<16x32xf32> -> vector<16x32xf32>
    %20 = vector.extract_strided_slice %1 {offsets = [0, 64], sizes = [1, 32], strides = [1, 1]} : vector<1x96xf32> to vector<1x32xf32>
    %21 = vector.broadcast %20 : vector<1x32xf32> to vector<16x32xf32>
    %22 = arith.addf %19, %21 : vector<16x32xf32>
    %cst_14 = arith.constant 0.353553385 : f32
    %23 = vector.broadcast %cst_14 : f32 to vector<16x32xf32>
    %24 = arith.mulf %12, %23 : vector<16x32xf32>
    %c0_15 = arith.constant 0 : index
    %c0_16 = arith.constant 0 : index
    %c0_17 = arith.constant 0 : index
    %25 = vector.load %arg6[%c0_15, %c0_16, %c0_17] : memref<2x8x8xi8, #tpu.memory_space<vmem>>, vector<2x8x8xi8>
    %26 = arith.sitofp %25 : vector<2x8x8xi8> to vector<2x8x8xf32>
    %cst_18 = arith.constant 0.000000e+00 : f32
    %27 = vector.broadcast %cst_18 : f32 to vector<2x8x8xf32>
    %28 = arith.cmpf oeq, %26, %27 : vector<2x8x8xf32>
    %cst_19 = arith.constant -1.000000e+20 : f32
    %cst_20 = arith.constant 0.000000e+00 : f32
    %29 = vector.broadcast %cst_19 : f32 to vector<2x8x8xf32>
    %30 = vector.broadcast %cst_20 : f32 to vector<2x8x8xf32>
    %31 = arith.select %28, %29, %30 : vector<2x8x8xi1>, vector<2x8x8xf32>
    %32 = vector.extract_strided_slice %24 {offsets = [0, 0], sizes = [8, 32], strides = [1, 1]} : vector<16x32xf32> to vector<8x32xf32>
    %33 = vector.extract_strided_slice %17 {offsets = [0, 0], sizes = [8, 32], strides = [1, 1]} : vector<16x32xf32> to vector<8x32xf32>
    %34 = vector.extract_strided_slice %22 {offsets = [0, 0], sizes = [8, 32], strides = [1, 1]} : vector<16x32xf32> to vector<8x32xf32>
    %35 = vector.extract_strided_slice %32 {offsets = [0, 0], sizes = [8, 8], strides = [1, 1]} : vector<8x32xf32> to vector<8x8xf32>
    %36 = vector.extract_strided_slice %33 {offsets = [0, 0], sizes = [8, 8], strides = [1, 1]} : vector<8x32xf32> to vector<8x8xf32>
    %37 = vector.extract_strided_slice %34 {offsets = [0, 0], sizes = [8, 8], strides = [1, 1]} : vector<8x32xf32> to vector<8x8xf32>
    %cst_21 = arith.constant dense<0.000000e+00> : vector<8x8xf32>
    %38 = tpu.matmul %35, %36, %cst_21 {dimension_numbers = #tpu.dot_dimension_numbers<[1], [1], [0], [0], [0, 0, 1, 0], [], []>} : vector<8x8xf32>, vector<8x8xf32>, vector<8x8xf32> -> vector<8x8xf32>
    %39 = vector.extract_strided_slice %31 {offsets = [0, 0, 0], sizes = [1, 8, 8], strides = [1, 1, 1]} : vector<2x8x8xf32> to vector<1x8x8xf32>
    %40 = vector.shape_cast %39 : vector<1x8x8xf32> to vector<8x8xf32>
    %41 = arith.addf %38, %40 : vector<8x8xf32>
    %cst_22 = arith.constant dense<0xFF800000> : vector<8xf32>
    %42 = vector.multi_reduction <maximumf>, %41, %cst_22 [1] : vector<8x8xf32> to vector<8xf32>
    %43 = vector.shape_cast %42 : vector<8xf32> to vector<8x1xf32>
    %44 = vector.broadcast %43 : vector<8x1xf32> to vector<8x8xf32>
    %45 = arith.subf %41, %44 : vector<8x8xf32>
    %46 = math.exp %45 : vector<8x8xf32>
    %cst_23 = arith.constant dense<0.000000e+00> : vector<8xf32>
    %47 = vector.multi_reduction <add>, %46, %cst_23 [1] : vector<8x8xf32> to vector<8xf32>
    %48 = vector.shape_cast %47 : vector<8xf32> to vector<8x1xf32>
    %49 = tpu.reciprocal %48 {approx = true} : vector<8x1xf32> -> vector<8x1xf32>
    %50 = arith.mulf %48, %49 : vector<8x1xf32>
    %cst_24 = arith.constant 2.000000e+00 : f32
    %51 = vector.broadcast %cst_24 : f32 to vector<8x1xf32>
    %52 = arith.subf %51, %50 : vector<8x1xf32>
    %53 = arith.mulf %49, %52 : vector<8x1xf32>
    %cst_25 = arith.constant dense<0.000000e+00> : vector<8x8xf32>
    %54 = tpu.matmul %46, %37, %cst_25 {dimension_numbers = #tpu.dot_dimension_numbers<[1], [0], [0], [1], [0, 0, 1, 1], [], []>} : vector<8x8xf32>, vector<8x8xf32>, vector<8x8xf32> -> vector<8x8xf32>
    %55 = vector.broadcast %53 : vector<8x1xf32> to vector<8x8xf32>
    %56 = arith.mulf %54, %55 : vector<8x8xf32>
    %57 = vector.extract_strided_slice %32 {offsets = [0, 8], sizes = [8, 8], strides = [1, 1]} : vector<8x32xf32> to vector<8x8xf32>
    %58 = vector.extract_strided_slice %33 {offsets = [0, 8], sizes = [8, 8], strides = [1, 1]} : vector<8x32xf32> to vector<8x8xf32>
    %59 = vector.extract_strided_slice %34 {offsets = [0, 8], sizes = [8, 8], strides = [1, 1]} : vector<8x32xf32> to vector<8x8xf32>
    %cst_26 = arith.constant dense<0.000000e+00> : vector<8x8xf32>
    %60 = tpu.matmul %57, %58, %cst_26 {dimension_numbers = #tpu.dot_dimension_numbers<[1], [1], [0], [0], [0, 0, 1, 0], [], []>} : vector<8x8xf32>, vector<8x8xf32>, vector<8x8xf32> -> vector<8x8xf32>
    %61 = vector.extract_strided_slice %31 {offsets = [0, 0, 0], sizes = [1, 8, 8], strides = [1, 1, 1]} : vector<2x8x8xf32> to vector<1x8x8xf32>
    %62 = vector.shape_cast %61 : vector<1x8x8xf32> to vector<8x8xf32>
    %63 = arith.addf %60, %62 : vector<8x8xf32>
    %cst_27 = arith.constant dense<0xFF800000> : vector<8xf32>
    %64 = vector.multi_reduction <maximumf>, %63, %cst_27 [1] : vector<8x8xf32> to vector<8xf32>
    %65 = vector.shape_cast %64 : vector<8xf32> to vector<8x1xf32>
    %66 = vector.broadcast %65 : vector<8x1xf32> to vector<8x8xf32>
    %67 = arith.subf %63, %66 : vector<8x8xf32>
    %68 = math.exp %67 : vector<8x8xf32>
    %cst_28 = arith.constant dense<0.000000e+00> : vector<8xf32>
    %69 = vector.multi_reduction <add>, %68, %cst_28 [1] : vector<8x8xf32> to vector<8xf32>
    %70 = vector.shape_cast %69 : vector<8xf32> to vector<8x1xf32>
    %71 = tpu.reciprocal %70 {approx = true} : vector<8x1xf32> -> vector<8x1xf32>
    %72 = arith.mulf %70, %71 : vector<8x1xf32>
    %cst_29 = arith.constant 2.000000e+00 : f32
    %73 = vector.broadcast %cst_29 : f32 to vector<8x1xf32>
    %74 = arith.subf %73, %72 : vector<8x1xf32>
    %75 = arith.mulf %71, %74 : vector<8x1xf32>
    %cst_30 = arith.constant dense<0.000000e+00> : vector<8x8xf32>
    %76 = tpu.matmul %68, %59, %cst_30 {dimension_numbers = #tpu.dot_dimension_numbers<[1], [0], [0], [1], [0, 0, 1, 1], [], []>} : vector<8x8xf32>, vector<8x8xf32>, vector<8x8xf32> -> vector<8x8xf32>
    %77 = vector.broadcast %75 : vector<8x1xf32> to vector<8x8xf32>
    %78 = arith.mulf %76, %77 : vector<8x8xf32>
    %79 = vector.extract_strided_slice %32 {offsets = [0, 16], sizes = [8, 8], strides = [1, 1]} : vector<8x32xf32> to vector<8x8xf32>
    %80 = vector.extract_strided_slice %33 {offsets = [0, 16], sizes = [8, 8], strides = [1, 1]} : vector<8x32xf32> to vector<8x8xf32>
    %81 = vector.extract_strided_slice %34 {offsets = [0, 16], sizes = [8, 8], strides = [1, 1]} : vector<8x32xf32> to vector<8x8xf32>
    %cst_31 = arith.constant dense<0.000000e+00> : vector<8x8xf32>
    %82 = tpu.matmul %79, %80, %cst_31 {dimension_numbers = #tpu.dot_dimension_numbers<[1], [1], [0], [0], [0, 0, 1, 0], [], []>} : vector<8x8xf32>, vector<8x8xf32>, vector<8x8xf32> -> vector<8x8xf32>
    %83 = vector.extract_strided_slice %31 {offsets = [0, 0, 0], sizes = [1, 8, 8], strides = [1, 1, 1]} : vector<2x8x8xf32> to vector<1x8x8xf32>
    %84 = vector.shape_cast %83 : vector<1x8x8xf32> to vector<8x8xf32>
    %85 = arith.addf %82, %84 : vector<8x8xf32>
    %cst_32 = arith.constant dense<0xFF800000> : vector<8xf32>
    %86 = vector.multi_reduction <maximumf>, %85, %cst_32 [1] : vector<8x8xf32> to vector<8xf32>
    %87 = vector.shape_cast %86 : vector<8xf32> to vector<8x1xf32>
    %88 = vector.broadcast %87 : vector<8x1xf32> to vector<8x8xf32>
    %89 = arith.subf %85, %88 : vector<8x8xf32>
    %90 = math.exp %89 : vector<8x8xf32>
    %cst_33 = arith.constant dense<0.000000e+00> : vector<8xf32>
    %91 = vector.multi_reduction <add>, %90, %cst_33 [1] : vector<8x8xf32> to vector<8xf32>
    %92 = vector.shape_cast %91 : vector<8xf32> to vector<8x1xf32>
    %93 = tpu.reciprocal %92 {approx = true} : vector<8x1xf32> -> vector<8x1xf32>
    %94 = arith.mulf %92, %93 : vector<8x1xf32>
    %cst_34 = arith.constant 2.000000e+00 : f32
    %95 = vector.broadcast %cst_34 : f32 to vector<8x1xf32>
    %96 = arith.subf %95, %94 : vector<8x1xf32>
    %97 = arith.mulf %93, %96 : vector<8x1xf32>
    %cst_35 = arith.constant dense<0.000000e+00> : vector<8x8xf32>
    %98 = tpu.matmul %90, %81, %cst_35 {dimension_numbers = #tpu.dot_dimension_numbers<[1], [0], [0], [1], [0, 0, 1, 1], [], []>} : vector<8x8xf32>, vector<8x8xf32>, vector<8x8xf32> -> vector<8x8xf32>
    %99 = vector.broadcast %97 : vector<8x1xf32> to vector<8x8xf32>
    %100 = arith.mulf %98, %99 : vector<8x8xf32>
    %101 = vector.extract_strided_slice %32 {offsets = [0, 24], sizes = [8, 8], strides = [1, 1]} : vector<8x32xf32> to vector<8x8xf32>
    %102 = vector.extract_strided_slice %33 {offsets = [0, 24], sizes = [8, 8], strides = [1, 1]} : vector<8x32xf32> to vector<8x8xf32>
    %103 = vector.extract_strided_slice %34 {offsets = [0, 24], sizes = [8, 8], strides = [1, 1]} : vector<8x32xf32> to vector<8x8xf32>
    %cst_36 = arith.constant dense<0.000000e+00> : vector<8x8xf32>
    %104 = tpu.matmul %101, %102, %cst_36 {dimension_numbers = #tpu.dot_dimension_numbers<[1], [1], [0], [0], [0, 0, 1, 0], [], []>} : vector<8x8xf32>, vector<8x8xf32>, vector<8x8xf32> -> vector<8x8xf32>
    %105 = vector.extract_strided_slice %31 {offsets = [0, 0, 0], sizes = [1, 8, 8], strides = [1, 1, 1]} : vector<2x8x8xf32> to vector<1x8x8xf32>
    %106 = vector.shape_cast %105 : vector<1x8x8xf32> to vector<8x8xf32>
    %107 = arith.addf %104, %106 : vector<8x8xf32>
    %cst_37 = arith.constant dense<0xFF800000> : vector<8xf32>
    %108 = vector.multi_reduction <maximumf>, %107, %cst_37 [1] : vector<8x8xf32> to vector<8xf32>
    %109 = vector.shape_cast %108 : vector<8xf32> to vector<8x1xf32>
    %110 = vector.broadcast %109 : vector<8x1xf32> to vector<8x8xf32>
    %111 = arith.subf %107, %110 : vector<8x8xf32>
    %112 = math.exp %111 : vector<8x8xf32>
    %cst_38 = arith.constant dense<0.000000e+00> : vector<8xf32>
    %113 = vector.multi_reduction <add>, %112, %cst_38 [1] : vector<8x8xf32> to vector<8xf32>
    %114 = vector.shape_cast %113 : vector<8xf32> to vector<8x1xf32>
    %115 = tpu.reciprocal %114 {approx = true} : vector<8x1xf32> -> vector<8x1xf32>
    %116 = arith.mulf %114, %115 : vector<8x1xf32>
    %cst_39 = arith.constant 2.000000e+00 : f32
    %117 = vector.broadcast %cst_39 : f32 to vector<8x1xf32>
    %118 = arith.subf %117, %116 : vector<8x1xf32>
    %119 = arith.mulf %115, %118 : vector<8x1xf32>
    %cst_40 = arith.constant dense<0.000000e+00> : vector<8x8xf32>
    %120 = tpu.matmul %112, %103, %cst_40 {dimension_numbers = #tpu.dot_dimension_numbers<[1], [0], [0], [1], [0, 0, 1, 1], [], []>} : vector<8x8xf32>, vector<8x8xf32>, vector<8x8xf32> -> vector<8x8xf32>
    %121 = vector.broadcast %119 : vector<8x1xf32> to vector<8x8xf32>
    %122 = arith.mulf %120, %121 : vector<8x8xf32>
    %123 = tpu.concatenate %56, %78, %100, %122 in 1 : vector<8x8xf32>, vector<8x8xf32>, vector<8x8xf32>, vector<8x8xf32> -> vector<8x32xf32>
    %124 = vector.extract_strided_slice %24 {offsets = [8, 0], sizes = [8, 32], strides = [1, 1]} : vector<16x32xf32> to vector<8x32xf32>
    %125 = vector.extract_strided_slice %17 {offsets = [8, 0], sizes = [8, 32], strides = [1, 1]} : vector<16x32xf32> to vector<8x32xf32>
    %126 = vector.extract_strided_slice %22 {offsets = [8, 0], sizes = [8, 32], strides = [1, 1]} : vector<16x32xf32> to vector<8x32xf32>
    %127 = vector.extract_strided_slice %124 {offsets = [0, 0], sizes = [8, 8], strides = [1, 1]} : vector<8x32xf32> to vector<8x8xf32>
    %128 = vector.extract_strided_slice %125 {offsets = [0, 0], sizes = [8, 8], strides = [1, 1]} : vector<8x32xf32> to vector<8x8xf32>
    %129 = vector.extract_strided_slice %126 {offsets = [0, 0], sizes = [8, 8], strides = [1, 1]} : vector<8x32xf32> to vector<8x8xf32>
    %cst_41 = arith.constant dense<0.000000e+00> : vector<8x8xf32>
    %130 = tpu.matmul %127, %128, %cst_41 {dimension_numbers = #tpu.dot_dimension_numbers<[1], [1], [0], [0], [0, 0, 1, 0], [], []>} : vector<8x8xf32>, vector<8x8xf32>, vector<8x8xf32> -> vector<8x8xf32>
    %131 = vector.extract_strided_slice %31 {offsets = [1, 0, 0], sizes = [1, 8, 8], strides = [1, 1, 1]} : vector<2x8x8xf32> to vector<1x8x8xf32>
    %132 = vector.shape_cast %131 : vector<1x8x8xf32> to vector<8x8xf32>
    %133 = arith.addf %130, %132 : vector<8x8xf32>
    %cst_42 = arith.constant dense<0xFF800000> : vector<8xf32>
    %134 = vector.multi_reduction <maximumf>, %133, %cst_42 [1] : vector<8x8xf32> to vector<8xf32>
    %135 = vector.shape_cast %134 : vector<8xf32> to vector<8x1xf32>
    %136 = vector.broadcast %135 : vector<8x1xf32> to vector<8x8xf32>
    %137 = arith.subf %133, %136 : vector<8x8xf32>
    %138 = math.exp %137 : vector<8x8xf32>
    %cst_43 = arith.constant dense<0.000000e+00> : vector<8xf32>
    %139 = vector.multi_reduction <add>, %138, %cst_43 [1] : vector<8x8xf32> to vector<8xf32>
    %140 = vector.shape_cast %139 : vector<8xf32> to vector<8x1xf32>
    %141 = tpu.reciprocal %140 {approx = true} : vector<8x1xf32> -> vector<8x1xf32>
    %142 = arith.mulf %140, %141 : vector<8x1xf32>
    %cst_44 = arith.constant 2.000000e+00 : f32
    %143 = vector.broadcast %cst_44 : f32 to vector<8x1xf32>
    %144 = arith.subf %143, %142 : vector<8x1xf32>
    %145 = arith.mulf %141, %144 : vector<8x1xf32>
    %cst_45 = arith.constant dense<0.000000e+00> : vector<8x8xf32>
    %146 = tpu.matmul %138, %129, %cst_45 {dimension_numbers = #tpu.dot_dimension_numbers<[1], [0], [0], [1], [0, 0, 1, 1], [], []>} : vector<8x8xf32>, vector<8x8xf32>, vector<8x8xf32> -> vector<8x8xf32>
    %147 = vector.broadcast %145 : vector<8x1xf32> to vector<8x8xf32>
    %148 = arith.mulf %146, %147 : vector<8x8xf32>
    %149 = vector.extract_strided_slice %124 {offsets = [0, 8], sizes = [8, 8], strides = [1, 1]} : vector<8x32xf32> to vector<8x8xf32>
    %150 = vector.extract_strided_slice %125 {offsets = [0, 8], sizes = [8, 8], strides = [1, 1]} : vector<8x32xf32> to vector<8x8xf32>
    %151 = vector.extract_strided_slice %126 {offsets = [0, 8], sizes = [8, 8], strides = [1, 1]} : vector<8x32xf32> to vector<8x8xf32>
    %cst_46 = arith.constant dense<0.000000e+00> : vector<8x8xf32>
    %152 = tpu.matmul %149, %150, %cst_46 {dimension_numbers = #tpu.dot_dimension_numbers<[1], [1], [0], [0], [0, 0, 1, 0], [], []>} : vector<8x8xf32>, vector<8x8xf32>, vector<8x8xf32> -> vector<8x8xf32>
    %153 = vector.extract_strided_slice %31 {offsets = [1, 0, 0], sizes = [1, 8, 8], strides = [1, 1, 1]} : vector<2x8x8xf32> to vector<1x8x8xf32>
    %154 = vector.shape_cast %153 : vector<1x8x8xf32> to vector<8x8xf32>
    %155 = arith.addf %152, %154 : vector<8x8xf32>
    %cst_47 = arith.constant dense<0xFF800000> : vector<8xf32>
    %156 = vector.multi_reduction <maximumf>, %155, %cst_47 [1] : vector<8x8xf32> to vector<8xf32>
    %157 = vector.shape_cast %156 : vector<8xf32> to vector<8x1xf32>
    %158 = vector.broadcast %157 : vector<8x1xf32> to vector<8x8xf32>
    %159 = arith.subf %155, %158 : vector<8x8xf32>
    %160 = math.exp %159 : vector<8x8xf32>
    %cst_48 = arith.constant dense<0.000000e+00> : vector<8xf32>
    %161 = vector.multi_reduction <add>, %160, %cst_48 [1] : vector<8x8xf32> to vector<8xf32>
    %162 = vector.shape_cast %161 : vector<8xf32> to vector<8x1xf32>
    %163 = tpu.reciprocal %162 {approx = true} : vector<8x1xf32> -> vector<8x1xf32>
    %164 = arith.mulf %162, %163 : vector<8x1xf32>
    %cst_49 = arith.constant 2.000000e+00 : f32
    %165 = vector.broadcast %cst_49 : f32 to vector<8x1xf32>
    %166 = arith.subf %165, %164 : vector<8x1xf32>
    %167 = arith.mulf %163, %166 : vector<8x1xf32>
    %cst_50 = arith.constant dense<0.000000e+00> : vector<8x8xf32>
    %168 = tpu.matmul %160, %151, %cst_50 {dimension_numbers = #tpu.dot_dimension_numbers<[1], [0], [0], [1], [0, 0, 1, 1], [], []>} : vector<8x8xf32>, vector<8x8xf32>, vector<8x8xf32> -> vector<8x8xf32>
    %169 = vector.broadcast %167 : vector<8x1xf32> to vector<8x8xf32>
    %170 = arith.mulf %168, %169 : vector<8x8xf32>
    %171 = vector.extract_strided_slice %124 {offsets = [0, 16], sizes = [8, 8], strides = [1, 1]} : vector<8x32xf32> to vector<8x8xf32>
    %172 = vector.extract_strided_slice %125 {offsets = [0, 16], sizes = [8, 8], strides = [1, 1]} : vector<8x32xf32> to vector<8x8xf32>
    %173 = vector.extract_strided_slice %126 {offsets = [0, 16], sizes = [8, 8], strides = [1, 1]} : vector<8x32xf32> to vector<8x8xf32>
    %cst_51 = arith.constant dense<0.000000e+00> : vector<8x8xf32>
    %174 = tpu.matmul %171, %172, %cst_51 {dimension_numbers = #tpu.dot_dimension_numbers<[1], [1], [0], [0], [0, 0, 1, 0], [], []>} : vector<8x8xf32>, vector<8x8xf32>, vector<8x8xf32> -> vector<8x8xf32>
    %175 = vector.extract_strided_slice %31 {offsets = [1, 0, 0], sizes = [1, 8, 8], strides = [1, 1, 1]} : vector<2x8x8xf32> to vector<1x8x8xf32>
    %176 = vector.shape_cast %175 : vector<1x8x8xf32> to vector<8x8xf32>
    %177 = arith.addf %174, %176 : vector<8x8xf32>
    %cst_52 = arith.constant dense<0xFF800000> : vector<8xf32>
    %178 = vector.multi_reduction <maximumf>, %177, %cst_52 [1] : vector<8x8xf32> to vector<8xf32>
    %179 = vector.shape_cast %178 : vector<8xf32> to vector<8x1xf32>
    %180 = vector.broadcast %179 : vector<8x1xf32> to vector<8x8xf32>
    %181 = arith.subf %177, %180 : vector<8x8xf32>
    %182 = math.exp %181 : vector<8x8xf32>
    %cst_53 = arith.constant dense<0.000000e+00> : vector<8xf32>
    %183 = vector.multi_reduction <add>, %182, %cst_53 [1] : vector<8x8xf32> to vector<8xf32>
    %184 = vector.shape_cast %183 : vector<8xf32> to vector<8x1xf32>
    %185 = tpu.reciprocal %184 {approx = true} : vector<8x1xf32> -> vector<8x1xf32>
    %186 = arith.mulf %184, %185 : vector<8x1xf32>
    %cst_54 = arith.constant 2.000000e+00 : f32
    %187 = vector.broadcast %cst_54 : f32 to vector<8x1xf32>
    %188 = arith.subf %187, %186 : vector<8x1xf32>
    %189 = arith.mulf %185, %188 : vector<8x1xf32>
    %cst_55 = arith.constant dense<0.000000e+00> : vector<8x8xf32>
    %190 = tpu.matmul %182, %173, %cst_55 {dimension_numbers = #tpu.dot_dimension_numbers<[1], [0], [0], [1], [0, 0, 1, 1], [], []>} : vector<8x8xf32>, vector<8x8xf32>, vector<8x8xf32> -> vector<8x8xf32>
    %191 = vector.broadcast %189 : vector<8x1xf32> to vector<8x8xf32>
    %192 = arith.mulf %190, %191 : vector<8x8xf32>
    %193 = vector.extract_strided_slice %124 {offsets = [0, 24], sizes = [8, 8], strides = [1, 1]} : vector<8x32xf32> to vector<8x8xf32>
    %194 = vector.extract_strided_slice %125 {offsets = [0, 24], sizes = [8, 8], strides = [1, 1]} : vector<8x32xf32> to vector<8x8xf32>
    %195 = vector.extract_strided_slice %126 {offsets = [0, 24], sizes = [8, 8], strides = [1, 1]} : vector<8x32xf32> to vector<8x8xf32>
    %cst_56 = arith.constant dense<0.000000e+00> : vector<8x8xf32>
    %196 = tpu.matmul %193, %194, %cst_56 {dimension_numbers = #tpu.dot_dimension_numbers<[1], [1], [0], [0], [0, 0, 1, 0], [], []>} : vector<8x8xf32>, vector<8x8xf32>, vector<8x8xf32> -> vector<8x8xf32>
    %197 = vector.extract_strided_slice %31 {offsets = [1, 0, 0], sizes = [1, 8, 8], strides = [1, 1, 1]} : vector<2x8x8xf32> to vector<1x8x8xf32>
    %198 = vector.shape_cast %197 : vector<1x8x8xf32> to vector<8x8xf32>
    %199 = arith.addf %196, %198 : vector<8x8xf32>
    %cst_57 = arith.constant dense<0xFF800000> : vector<8xf32>
    %200 = vector.multi_reduction <maximumf>, %199, %cst_57 [1] : vector<8x8xf32> to vector<8xf32>
    %201 = vector.shape_cast %200 : vector<8xf32> to vector<8x1xf32>
    %202 = vector.broadcast %201 : vector<8x1xf32> to vector<8x8xf32>
    %203 = arith.subf %199, %202 : vector<8x8xf32>
    %204 = math.exp %203 : vector<8x8xf32>
    %cst_58 = arith.constant dense<0.000000e+00> : vector<8xf32>
    %205 = vector.multi_reduction <add>, %204, %cst_58 [1] : vector<8x8xf32> to vector<8xf32>
    %206 = vector.shape_cast %205 : vector<8xf32> to vector<8x1xf32>
    %207 = tpu.reciprocal %206 {approx = true} : vector<8x1xf32> -> vector<8x1xf32>
    %208 = arith.mulf %206, %207 : vector<8x1xf32>
    %cst_59 = arith.constant 2.000000e+00 : f32
    %209 = vector.broadcast %cst_59 : f32 to vector<8x1xf32>
    %210 = arith.subf %209, %208 : vector<8x1xf32>
    %211 = arith.mulf %207, %210 : vector<8x1xf32>
    %cst_60 = arith.constant dense<0.000000e+00> : vector<8x8xf32>
    %212 = tpu.matmul %204, %195, %cst_60 {dimension_numbers = #tpu.dot_dimension_numbers<[1], [0], [0], [1], [0, 0, 1, 1], [], []>} : vector<8x8xf32>, vector<8x8xf32>, vector<8x8xf32> -> vector<8x8xf32>
    %213 = vector.broadcast %211 : vector<8x1xf32> to vector<8x8xf32>
    %214 = arith.mulf %212, %213 : vector<8x8xf32>
    %215 = tpu.concatenate %148, %170, %192, %214 in 1 : vector<8x8xf32>, vector<8x8xf32>, vector<8x8xf32>, vector<8x8xf32> -> vector<8x32xf32>
    %216 = tpu.concatenate %123, %215 in 0 : vector<8x32xf32>, vector<8x32xf32> -> vector<16x32xf32>
    %217 = vector.shape_cast %216 : vector<16x32xf32> to vector<2x8x32xf32>
    %c0_61 = arith.constant 0 : index
    %c0_62 = arith.constant 0 : index
    %c0_63 = arith.constant 0 : index
    %218 = vector.load %arg7[%c0_61, %c0_62, %c0_63] : memref<2x8x32xf32, #tpu.memory_space<vmem>>, vector<2x8x32xf32>
    tpu.vector_store %arg7[%c0_61, %c0_62, %c0_63], %217 {strides = array<i32>} : memref<2x8x32xf32, #tpu.memory_space<vmem>>, vector<2x8x32xf32>,
    return
  }
  func.func @transform_0(%arg0: i32) -> (i32, i32, i32) {
    %c0_i32 = arith.constant 0 : i32
    %c0_i32_0 = arith.constant 0 : i32
    %c0_i32_1 = arith.constant 0 : i32
    return %arg0, %c0_i32, %c0_i32_0 : i32, i32, i32
  }
  func.func @transform_1(%arg0: i32) -> (i32, i32, i32) {
    %c0_i32 = arith.constant 0 : i32
    %c0_i32_0 = arith.constant 0 : i32
    %c0_i32_1 = arith.constant 0 : i32
    return %arg0, %c0_i32, %c0_i32_0 : i32, i32, i32
  }
  func.func @transform_2(%arg0: i32) -> (i32, i32, i32) {
    %c0_i32 = arith.constant 0 : i32
    %c0_i32_0 = arith.constant 0 : i32
    %c0_i32_1 = arith.constant 0 : i32
    return %arg0, %c0_i32, %c0_i32_0 : i32, i32, i32
  }
  func.func @transform_3(%arg0: i32) -> (i32, i32) {
    %c0_i32 = arith.constant 0 : i32
    %c0_i32_0 = arith.constant 0 : i32
    %c0_i32_1 = arith.constant 0 : i32
    return %c0_i32, %c0_i32_0 : i32, i32
  }
  func.func @transform_4(%arg0: i32) -> (i32, i32) {
    %c0_i32 = arith.constant 0 : i32
    %c0_i32_0 = arith.constant 0 : i32
    %c0_i32_1 = arith.constant 0 : i32
    return %c0_i32, %c0_i32_0 : i32, i32
  }
  func.func @transform_5(%arg0: i32) -> (i32, i32, i32) {
    %c0_i32 = arith.constant 0 : i32
    %c0_i32_0 = arith.constant 0 : i32
    %c0_i32_1 = arith.constant 0 : i32
    return %arg0, %c0_i32, %c0_i32_0 : i32, i32, i32
  }
  func.func @transform_6(%arg0: i32) -> (i32, i32, i32) {
    %c0_i32 = arith.constant 0 : i32
    %c0_i32_0 = arith.constant 0 : i32
    %c0_i32_1 = arith.constant 0 : i32
    return %arg0, %c0_i32, %c0_i32_0 : i32, i32, i32
  }
}

</mosaic_0001>

<bundles_post_ra>
// kernel: tpu_custom_call.1
= control target key start
LH: loop header
LB: loop body
LE: loop exit
PB: predicated region body
PF: predicated region fallthrough
CT: control target
= control target key end

     0   :  { %vm49_vm0 = vcmask 261120   ;;  %s2332_s0 = inlined_call_operand.vmem [shape: f32[2,8,32], index: 0, kind: input, shape index: {}]   ;;  %s2333_s1 = inlined_call_operand.vmem [shape: f32[2,8,32], index: 1, kind: input, shape index: {}]   ;;  %s2334_s2 = inlined_call_operand.vmem [shape: f32[2,8,32], index: 2, kind: input, shape index: {}]   ;;  %s2335_s3 = inlined_call_operand.vmem [shape: f32[96,32], index: 3, kind: input, shape index: {}]   ;;  %s2336_s4 = inlined_call_operand.vmem [shape: f32[1,96], index: 4, kind: input, shape index: {}]   ;;  %s2337_s5 = inlined_call_operand.vmem [shape: s8[2,8,8], index: 5, kind: input, shape index: {}]   ;;  %s2338_s6 = inlined_call_operand.hbm [shape: f32[2,8,32], index: 6, kind: output, shape index: {}]  }
   0x1   :  { %v27_v0 = vld [vmem:[%s2335_s3 + $0x18] sm:$0xff]  ;;  %v26_v2 = vld [vmem:[%s2335_s3 + $0x10] sm:$0xff]  ;;  %v37_v4 = vld [vmem:[%s2332_s0] sm:$0xff] }
   0x2   :  { %v31_v1 = vld [vmem:[%s2335_s3 + $0x38] sm:$0xff]  ;;  %1831 = vmatprep.subr.msk.mxu0 %vm49_vm0, %v27_v0  ;;  %v30_v3 = vld [vmem:[%s2335_s3 + $0x30] sm:$0xff]  ;;  %v25_v5 = vld [vmem:[%s2335_s3 + $0x8] sm:$0xff]  ;;  %1839 = vmatprep.mubr.msk.f32.mxu0 %vm49_vm0, %v37_v4 }
   0x3   :  { %1842 = vmatprep.subr.msk.mxu1 %vm49_vm0, %v31_v1  ;;  %1832 = vmatpush3.xpose.msk.msra.mxu0 %vm49_vm0, %v27_v0  ;;  %v39_v6 = vld [vmem:[%s2333_s1] sm:$0xff]  ;;  %v29_v7 = vld [vmem:[%s2335_s3 + $0x28] sm:$0xff] }
   0x4   :  { %1843 = vmatpush3.xpose.msk.msra.mxu1 %vm49_vm0, %v31_v1  ;;  %1833 = vmatprep.subr.msk.mxu0 %vm49_vm0, %v26_v2  ;;  %v2092_v8 = vld [vmem:[%s2336_s4] ss:$0 sm:$0xff] }
   0x5   :  { %1844 = vmatprep.subr.msk.mxu1 %vm49_vm0, %v30_v3  ;;  %1850 = vmatprep.mubr.msk.f32.mxu1 %vm49_vm0, %v39_v6 }
   0x6   :  { %11 = vsyncpa [#allocation3], 0  ;;  %s2010_s15 = smov 96   ;;  %v24_v9 = vld [vmem:[%s2335_s3] sm:$0xff]  ;;  %v38_v11 = vld [vmem:[%s2332_s0 + $0x8] sm:$0xff]  ;;  %s2011_s23 = smov 64  }
   0x7   :  { %143 = vrot.lane.b32.xlu0 %v2092_v8, %s2010_s15  ;;  %1834 = vmatpush3.xpose.msk.msra.mxu0 %vm49_vm0, %v26_v2  ;;  %v28_v10 = vld [vmem:[%s2335_s3 + $0x20] sm:$0xff]  ;;  %v40_v12 = vld [vmem:[%s2333_s1 + $0x8] sm:$0xff]  ;;  %v2012_v13 = vmov 0.0   ;;  %vm2013_vm1 = vmmov 0   ;;  %v35_v14 = vld [vmem:[%s2335_s3 + $0x58] sm:$0xff]  ;;  %vm347_vm2 = vcmask 64512  }
   0x8   :  { %1845 = vmatpush3.xpose.msk.msra.mxu1 %vm49_vm0, %v30_v3  ;;  %1835 = vmatprep.subr.msk.mxu0 %vm49_vm0, %v25_v5  ;;  %v34_v15 = vld [vmem:[%s2335_s3 + $0x50] sm:$0xff]  ;;  %v33_v16 = vld [vmem:[%s2335_s3 + $0x48] sm:$0xff]  ;;  %v32_v17 = vld [vmem:[%s2335_s3 + $0x40] sm:$0xff]  ;;  %s2014_s3 = smov 120   ;;  %s2016_s10 = smov 104   ;;  %vm1029_vm5 = vcmask 130048  }
   0x9   :  { %1846 = vmatprep.subr.msk.mxu1 %vm49_vm0, %v29_v7  ;;  %239 = vrot.lane.b32.xlu1 %v2092_v8, %s2011_s23  ;;  %v41_v18 = vld [vmem:[%s2334_s2] sm:$0xff]  ;;  %v42_v19 = vld [vmem:[%s2334_s2 + $0x8] sm:$0xff]  ;;  %s2015_s2 = smov 112   ;;  %s2018_s13 = smov 16   ;;  %vm1031_vm6 = vcmask 195584  }
   0xa   :  { %v1778_v40 = vld [vmem:[%s2337_s5] sm:$0xf]   ;;  %s2017_s5 = smov 8   ;;  %s2019_s14 = smov 24  }
   0xb   :  { %1836 = vmatpush3.xpose.msk.msra.mxu0 %vm49_vm0, %v25_v5  ;;  %v1779_v42 = vunpack.c.0.s8 %v1778_v40  ;;  %v1780_v51 = vunpack.c.1.s8 %v1778_v40  ;;  %s2020_s15 = smov [#allocation2]  }
   0xc   :  { %1847 = vmatpush3.xpose.msk.msra.mxu1 %vm49_vm0, %v29_v7  ;;  %1837 = vmatprep.subr.msk.mxu0 %vm49_vm0, %v24_v9  ;;  %s1723_s16 = sshll.u32 %s2020_s15, 4  ;;  %s1724_s16 = int_to_ptr.vmem [resolvable:$true] %s1723_s16 }
   0xd   :  { %1848 = vmatprep.subr.msk.mxu1 %vm49_vm0, %v28_v10  ;;  %v341_v45 = vcvt.s32.f32 %v1779_v42  ;;  %v342_v56 = vcvt.s32.f32 %v1780_v51  ;;  %s1988_s17 = scalar_lea.vmem %s1724_s16, 256  ;;  %p1993_p1 = scmp.lt.s32.totalorder %s1724_s16, %s1724_s16 }
   0xe   :  { %p1989_p0 = scmp.ne.s32.totalorder %s1724_s16, %s1988_s17  ;;  %p1994_p2 = scmp.lt.s32.totalorder %s1988_s17, %s1988_s17 }
   0xf   :  { %1838 = vmatpush3.xpose.msk.msra.mxu0 %vm49_vm0, %v24_v9  ;;  %vm343_vm3 = vcmp.eq.f32.partialorder %v341_v45, 0.0  ;;  %vm344_vm4 = vcmp.eq.f32.partialorder %v342_v56, 0.0 }
  0x10   :  { %1849 = vmatpush3.xpose.msk.msra.mxu1 %vm49_vm0, %v28_v10  ;;  %1853 = vmatprep.subr.msk.mxu0 %vm49_vm0, %v35_v14  ;;  %v2209_v46 = vsel %vm343_vm3, -1e+20, %v2012_v13  ;;  %v346_v60 = vsel %vm344_vm4, -1e+20, %v2012_v13  ;;  %p1995_p3 = por %p1994_p2, %p1993_p1 }
  0x11   :  { %1864 = vmatprep.subr.mxu1 %v2012_v13 }
  0x12   :  { %1840 = vmatmul.mubr.msk.f32.vlgmr.msra.gmra.mxu0 %vm49_vm0, %v38_v11  ;;  %p1996_p4 = pnand %p1995_p3, %p1989_p0 }
  0x13   :  { %1851 = vmatmul.mubr.msk.f32.vlgmr.msra.gmra.mxu1 %vm49_vm0, %v40_v12  ;;  %1854 = vmatpush3.xpose.msk.msra.mxu0 %vm49_vm0, %v35_v14 }
  0x14   :  { %1866 = vmatprep.mubr.msk.f32.mxu1 %vm2013_vm1, %v2012_v13  ;;  %1855 = vmatprep.subr.msk.mxu0 %vm49_vm0, %v34_v15 }
  0x15   :  { %1861 = vmatprep.mubr.msk.f32.mxu0 %vm49_vm0, %v41_v18 }
  0x17   :  { %1856 = vmatpush3.xpose.msk.msra.mxu0 %vm49_vm0, %v34_v15 }
  0x18   :  { %1857 = vmatprep.subr.msk.mxu0 %vm49_vm0, %v33_v16 }
  0x1b   :  { %1858 = vmatpush3.xpose.msk.msra.mxu0 %vm49_vm0, %v33_v16 }
  0x1c   :  { %1859 = vmatprep.subr.msk.mxu0 %vm49_vm0, %v32_v17 }
  0x1f   :  { %1860 = vmatpush3.xpose.msk.msra.mxu0 %vm49_vm0, %v32_v17 }
  0x20   :  { %1884 = vmatprep.subr.mxu0 %v2012_v13 }
  0x22   :  { %1862 = vmatmul.mubr.msk.f32.vlgmr.msra.gmra.mxu0 %vm49_vm0, %v42_v19 }
  0x23   :  { %1886 = vmatprep.mubr.msk.f32.mxu0 %vm2013_vm1, %v2012_v13 }
  0x79   :  { %v144_v22 = vpop.permute.xlu0 %143 }
  0x7b   :  { %v2172_v31 = vpop.permute.xlu1 %239 }
  0xd2   :  { %v1841_v20 = vpop.f32.mrf.mxu0 }
  0xd3   :  { %v1852_v21 = vpop.f32.mrf.mxu1  ;;  %v140_v28 = vadd.f32 %v1841_v20, %v2092_v8 }
  0xd4   :  { %v134_v23 = vpop.f32.mrf.mxu0  ;;  %v236_v29 = vadd.f32 %v1852_v21, %v144_v22 }
  0xd5   :  { %v230_v24 = vpop.f32.mrf.mxu1  ;;  %v135_v25 = vadd.f32 %v2092_v8, %v134_v23  ;;  %v336_v30 = vmul.f32 0.35355338, %v140_v28 }
  0xd6   :  { %v231_v26 = vadd.f32 %v230_v24, %v144_v22 }
  0xd7   :  { %v335_v27 = vmul.f32 0.35355338, %v135_v25 }
  0xd8   :  { %513 = vrot.lane.b32.xlu1 %v231_v26, %s2014_s3  ;;  %1865 = vmatpush3.xpose.msk.msra.mxu1 %vm347_vm2, %v231_v26 }
  0xd9   :  { %1869 = vmatprep.subr.mxu1 %v2012_v13 }
  0xdb   :  { %1867 = vmatmul.mubr.msk.f32.vlgmr.msra.gmra.mxu1 %vm347_vm2, %v335_v27 }
  0xdc   :  { %511 = vrot.lane.b32.xlu1 %v335_v27, %s2014_s3  ;;  %1871 = vmatprep.mubr.msk.f32.mxu1 %vm2013_vm1, %v2012_v13 }
  0xe0   :  { %682 = vrot.lane.b32.xlu1 %v231_v26, %s2015_s2 }
  0xe2   :  { %v2201_v41 = vpop.f32.mrf.mxu0 }
  0xe4   :  { %680 = vrot.lane.b32.xlu1 %v335_v27, %s2015_s2  ;;  %v326_v43 = vpop.f32.mrf.mxu0 }
  0xe5   :  { %v2204_v44 = vadd.f32 %v326_v43, %v2172_v31 }
  0xe7   :  { %1870 = vmatpush3.msra.mxu1 %v2204_v44 }
  0xe8   :  { %850 = vrot.lane.b32.xlu1 %v231_v26, %s2016_s10  ;;  %1874 = vmatprep.subr.mxu1 %v2012_v13 }
  0xec   :  { %848 = vrot.lane.b32.xlu1 %v335_v27, %s2016_s10 }
  0xf0   :  { %1198 = vrot.lane.b32.xlu1 %v236_v29, %s2014_s3 }
  0xf4   :  { %1196 = vrot.lane.b32.xlu1 %v336_v30, %s2014_s3 }
  0xf8   :  { %1365 = vrot.lane.b32.xlu1 %v336_v30, %s2015_s2 }
  0xfc   :  { %1535 = vrot.lane.b32.xlu1 %v236_v29, %s2016_s10 }
 0x100   :  { %1533 = vrot.lane.b32.xlu1 %v336_v30, %s2016_s10 }
 0x14a   :  { %v2174_v32 = vpop.permute.xlu1 %513 }
 0x14e   :  { %v2176_v33 = vpop.permute.xlu1 %511 }
 0x152   :  { %v683_v34 = vpop.permute.xlu1 %682 }
 0x153   :  { %1885 = vmatpush3.xpose.msk.msra.mxu0 %vm347_vm2, %v683_v34 }
 0x154   :  { %1894 = vmatprep.subr.mxu0 %v2012_v13 }
 0x156   :  { %v681_v35 = vpop.permute.xlu1 %680 }
 0x157   :  { %1887 = vmatmul.mubr.msk.f32.vlgmr.msra.gmra.mxu0 %vm347_vm2, %v681_v35 }
 0x158   :  { %1896 = vmatprep.mubr.msk.f32.mxu0 %vm2013_vm1, %v2012_v13 }
 0x15a   :  { %v851_v36 = vpop.permute.xlu1 %850 }
 0x15b   :  { %1895 = vmatpush3.xpose.msk.msra.mxu0 %vm347_vm2, %v851_v36 }
 0x15c   :  { %1904 = vmatprep.subr.mxu0 %v2012_v13 }
 0x15e   :  { %v849_v37 = vpop.permute.xlu1 %848 }
 0x15f   :  { %1897 = vmatmul.mubr.msk.f32.vlgmr.msra.gmra.mxu0 %vm347_vm2, %v849_v37 }
 0x160   :  { %1905 = vmatpush3.xpose.msk.msra.mxu0 %vm347_vm2, %v236_v29  ;;  %1906 = vmatprep.mubr.msk.f32.mxu0 %vm2013_vm1, %v2012_v13 }
 0x161   :  { %1914 = vmatprep.subr.mxu0 %v2012_v13 }
 0x162   :  { %v1199_v38 = vpop.permute.xlu1 %1198 }
 0x163   :  { %1907 = vmatmul.mubr.msk.f32.vlgmr.msra.gmra.mxu0 %vm347_vm2, %v336_v30 }
 0x164   :  { %1915 = vmatpush3.xpose.msk.msra.mxu0 %vm347_vm2, %v1199_v38  ;;  %1916 = vmatprep.mubr.msk.f32.mxu0 %vm2013_vm1, %v2012_v13 }
 0x165   :  { %1924 = vmatprep.subr.mxu0 %v2012_v13 }
 0x166   :  { %v1197_v39 = vpop.permute.xlu1 %1196 }
 0x167   :  { %1917 = vmatmul.mubr.msk.f32.vlgmr.msra.gmra.mxu0 %vm347_vm2, %v1197_v39 }
 0x168   :  { %1926 = vmatprep.mubr.msk.f32.mxu0 %vm2013_vm1, %v2012_v13 }
 0x16a   :  { %v1366_v2 = vpop.permute.xlu1 %1365 }
 0x16e   :  { %v1536_v11 = vpop.permute.xlu1 %1535 }
 0x172   :  { %v1534_v12 = vpop.permute.xlu1 %1533 }
 0x19b   :  { %v420_v47 = vpop.f32.mrf.mxu1 }
 0x19c   :  { %v421_v48 = vadd.f32 %v420_v47, %v2209_v46 }
 0x19d   :  { %v1868_v49 = vpop.f32.mrf.mxu1 }
 0x19e   :  { %v424_v50 = vsel %vm347_vm2, %v421_v48, -inf }
 0x19f   :  { %425 = vmax.xlane.f32.xlu0 %v424_v50 }
 0x1b5   :  { %1367 = vrot.lane.b32.xlu0 %v236_v29, %s2015_s2 }
 0x217   :  { %v754_v52 = vpop.f32.mrf.mxu0 }
 0x218   :  { %v2215_v53 = vadd.f32 %v754_v52, %v2209_v46 }
 0x219   :  { %v1888_v54 = vpop.f32.mrf.mxu0 }
 0x21a   :  { %v758_v55 = vsel %vm347_vm2, %v2215_v53, -inf }
 0x21b   :  { %759 = vmax.xlane.f32.xlu0 %v758_v55 }
 0x21f   :  { %v922_v57 = vpop.f32.mrf.mxu0 }
 0x220   :  { %v2220_v58 = vadd.f32 %v922_v57, %v2209_v46 }
 0x221   :  { %v1898_v59 = vpop.f32.mrf.mxu0 }
 0x222   :  { %v926_v61 = vsel %vm347_vm2, %v2220_v58, -inf }
 0x223   :  { %927 = vmax.xlane.f32.xlu1 %v926_v61  ;;  %v1105_v62 = vpop.f32.mrf.mxu0 }
 0x224   :  { %v2225_v63 = vadd.f32 %v1105_v62, %v346_v60 }
 0x225   :  { %v1908_v0 = vpop.f32.mrf.mxu0 }
 0x226   :  { %v1109_v1 = vsel %vm347_vm2, %v2225_v63, -inf }
 0x227   :  { %v1270_v3 = vpop.f32.mrf.mxu0  ;;  %1110 = vmax.xlane.f32.xlu0 %v1109_v1 }
 0x228   :  { %v1271_v4 = vadd.f32 %v1270_v3, %v346_v60  ;;  %v426_v5 = vpop.xlane.xlu0 %425 }
 0x229   :  { %v427_v6 = vsub.f32 %v421_v48, %v426_v5  ;;  %v1918_v7 = vpop.f32.mrf.mxu0 }
 0x22a   :  { %v1274_v8 = vsel %vm347_vm2, %v1271_v4, -inf }
 0x22b   :  { %v428_v9 = vmul.f32 1.442695, %v427_v6  ;;  %1275 = vmax.xlane.f32.xlu1 %v1274_v8 }
 0x22c   :  { %v1368_v10 = vpop.permute.xlu0 %1367 }
 0x22d   :  { %1956 = vpow2.f32 %v428_v9  ;;  %1925 = vmatpush3.xpose.msk.msra.mxu0 %vm347_vm2, %v1368_v10 }
 0x22e   :  { %1934 = vmatprep.subr.mxu0 %v2012_v13 }
 0x230   :  { %1927 = vmatmul.mubr.msk.f32.vlgmr.msra.gmra.mxu0 %vm347_vm2, %v1366_v2 }
 0x231   :  { %1935 = vmatpush3.xpose.msk.msra.mxu0 %vm347_vm2, %v1536_v11  ;;  %1936 = vmatprep.mubr.msk.f32.mxu0 %vm2013_vm1, %v2012_v13 }
 0x234   :  { %1937 = vmatmul.mubr.msk.f32.vlgmr.msra.gmra.mxu0 %vm347_vm2, %v1534_v12 }
 0x23a   :  { %v1957_v14 = vpop.eup %1956 }
 0x23b   :  { %1872 = vmatmul.mubr.msk.f32.vlgmr.msra.gmra.mxu1 %vm347_vm2, %v1957_v14 }
 0x23c   :  { %1875 = vmatpush3.xpose.msk.msra.mxu1 %vm347_vm2, %v2174_v32  ;;  %1876 = vmatprep.mubr.msk.f32.mxu1 %vm2013_vm1, %v2012_v13 }
 0x23d   :  { %603 = vrot.lane.b32.xlu0 %v2204_v44, %s2014_s3  ;;  %1879 = vmatprep.subr.mxu1 %v2012_v13 }
 0x23f   :  { %1877 = vmatmul.mubr.msk.f32.vlgmr.msra.gmra.mxu1 %vm347_vm2, %v2176_v33  ;;  %v2260_v33 = vadd.f32 %v2201_v41, %v2172_v31  ;;  %v430_v31 = vsel %vm347_vm2, %v1957_v14, 0.0 }
 0x240   :  { %1881 = vmatprep.mubr.msk.f32.mxu1 %vm2013_vm1, %v2012_v13 }
 0x2a4   :  { %v760_v15 = vpop.xlane.xlu0 %759 }
 0x2a5   :  { %v761_v37 = vsub.f32 %v2215_v53, %v760_v15 }
 0x2a7   :  { %v762_v39 = vmul.f32 1.442695, %v761_v37 }
 0x2ac   :  { %v928_v34 = vpop.xlane.xlu1 %927 }
 0x2ad   :  { %v929_v50 = vsub.f32 %v2220_v58, %v928_v34 }
 0x2af   :  { %v930_v54 = vmul.f32 1.442695, %v929_v50 }
 0x2b0   :  { %v2249_v16 = vpop.xlane.xlu0 %1110 }
 0x2b4   :  { %v604_v17 = vpop.permute.xlu0 %603  ;;  %v1276_v35 = vpop.xlane.xlu1 %1275 }
 0x2b5   :  { %1880 = vmatpush3.msra.mxu1 %v604_v17  ;;  %v1277_v36 = vsub.f32 %v1271_v4, %v1276_v35 }
 0x2b6   :  { %1889 = vmatprep.subr.mxu1 %v2012_v13 }
 0x2b7   :  { %v1278_v38 = vmul.f32 1.442695, %v1277_v36 }
 0x2b9   :  { %1958 = vpow2.f32 %v1278_v38 }
 0x2ba   :  { %1960 = vpow2.f32 %v762_v39 }
 0x2c6   :  { %v1959_v40 = vpop.eup %1958 }
 0x2c7   :  { %v1280_v41 = vsel %vm347_vm2, %v1959_v40, 0.0  ;;  %v1961_v42 = vpop.eup %1960 }
 0x2c8   :  { %v764_v43 = vsel %vm347_vm2, %v1961_v42, 0.0 }
 0x2f0   :  { %v1439_v18 = vpop.f32.mrf.mxu0 }
 0x2f1   :  { %v1440_v19 = vadd.f32 %v1439_v18, %v346_v60 }
 0x2f2   :  { %v1928_v20 = vpop.f32.mrf.mxu0 }
 0x2f3   :  { %v1443_v21 = vsel %vm347_vm2, %v1440_v19, -inf }
 0x2f4   :  { %1444 = vmax.xlane.f32.xlu0 %v1443_v21  ;;  %v1607_v22 = vpop.f32.mrf.mxu0 }
 0x2f5   :  { %v1608_v23 = vadd.f32 %v1607_v22, %v346_v60  ;;  %v1112_v60 = vsub.f32 %v2225_v63, %v2249_v16 }
 0x2f6   :  { %v1938_v24 = vpop.f32.mrf.mxu0 }
 0x2f7   :  { %v1611_v25 = vsel %vm347_vm2, %v1608_v23, -inf  ;;  %v1113_v61 = vmul.f32 1.442695, %v1112_v60 }
 0x2f8   :  { %1612 = vmax.xlane.f32.xlu1 %v1611_v25 }
 0x2fb   :  { %v2254_v26 = vpop.f32.mrf.mxu1 }
 0x2fd   :  { %v1873_v27 = vpop.f32.mrf.mxu1 }
 0x2ff   :  { %v585_v28 = vpop.f32.mrf.mxu1 }
 0x300   :  { %v586_v29 = vadd.f32 %v585_v28, %v2209_v46 }
 0x301   :  { %v1878_v30 = vpop.f32.mrf.mxu1 }
 0x302   :  { %v589_v32 = vsel %vm347_vm2, %v586_v29, -inf }
 0x303   :  { %590 = vmax.xlane.f32.xlu1 %v589_v32 }
 0x30a   :  { %1456 = vrot.lane.b32.xlu0 %v2260_v33, %s2015_s2 }
 0x314   :  { %771 = vrot.lane.b32.xlu1 %v2204_v44, %s2015_s2 }
 0x318   :  { %939 = vrot.lane.b32.xlu1 %v2204_v44, %s2016_s10 }
 0x31c   :  { %1288 = vrot.lane.b32.xlu1 %v2260_v33, %s2014_s3 }
 0x320   :  { %1624 = vrot.lane.b32.xlu1 %v2260_v33, %s2016_s10 }
 0x329   :  { %431 = vadd.xlane.f32.xlu0 %v430_v31 }
 0x32d   :  { %1281 = vadd.xlane.f32.xlu0 %v1280_v41 }
 0x331   :  { %765 = vadd.xlane.f32.xlu0 %v764_v43 }
 0x37d   :  { %v1445_v44 = vpop.xlane.xlu0 %1444 }
 0x37e   :  { %v1446_v45 = vsub.f32 %v1440_v19, %v1445_v44 }
 0x380   :  { %v1447_v46 = vmul.f32 1.442695, %v1446_v45 }
 0x381   :  { %v1613_v47 = vpop.xlane.xlu1 %1612  ;;  %v1457_v5 = vpop.permute.xlu0 %1456 }
 0x382   :  { %1962 = vpow2.f32 %v1447_v46  ;;  %v1614_v48 = vsub.f32 %v1608_v23, %v1613_v47 }
 0x384   :  { %v1615_v49 = vmul.f32 1.442695, %v1614_v48 }
 0x386   :  { %1964 = vpow2.f32 %v1615_v49 }
 0x38c   :  { %v591_v51 = vpop.xlane.xlu1 %590 }
 0x38d   :  { %v592_v52 = vsub.f32 %v586_v29, %v591_v51 }
 0x38f   :  { %v1963_v53 = vpop.eup %1962  ;;  %v593_v55 = vmul.f32 1.442695, %v592_v52 }
 0x390   :  { %v1449_v56 = vsel %vm347_vm2, %v1963_v53, 0.0  ;;  %v772_v58 = vpop.permute.xlu1 %771 }
 0x391   :  { %1966 = vpow2.f32 %v593_v55  ;;  %1450 = vadd.xlane.f32.xlu0 %v1449_v56 }
 0x392   :  { %1968 = vpow2.f32 %v930_v54 }
 0x393   :  { %v1965_v57 = vpop.eup %1964  ;;  %1970 = vpow2.f32 %v1113_v61 }
 0x394   :  { %v1617_v59 = vsel %vm347_vm2, %v1965_v57, 0.0  ;;  %v940_v2 = vpop.permute.xlu1 %939 }
 0x395   :  { %1618 = vadd.xlane.f32.xlu0 %v1617_v59 }
 0x398   :  { %v1289_v4 = vpop.permute.xlu1 %1288 }
 0x39c   :  { %v1625_v6 = vpop.permute.xlu1 %1624 }
 0x39e   :  { %v1967_v62 = vpop.eup %1966 }
 0x39f   :  { %1882 = vmatmul.mubr.msk.f32.vlgmr.msra.gmra.mxu1 %vm347_vm2, %v1967_v62  ;;  %v595_v0 = vsel %vm347_vm2, %v1967_v62, 0.0  ;;  %v1969_v1 = vpop.eup %1968 }
 0x3a0   :  { %1890 = vmatpush3.msra.mxu1 %v772_v58  ;;  %596 = vadd.xlane.f32.xlu1 %v595_v0  ;;  %v932_v63 = vsel %vm347_vm2, %v1969_v1, 0.0  ;;  %v2296_v3 = vpop.eup %1970 }
 0x3a1   :  { %1891 = vmatprep.mubr.msk.f32.mxu1 %vm2013_vm1, %v2012_v13  ;;  %1899 = vmatprep.subr.mxu1 %v2012_v13  ;;  %v1115_v60 = vsel %vm347_vm2, %v2296_v3, 0.0 }
 0x3a3   :  { %1892 = vmatmul.mubr.msk.f32.vlgmr.msra.gmra.mxu1 %vm347_vm2, %v1961_v42 }
 0x3a4   :  { %1900 = vmatpush3.msra.mxu1 %v940_v2  ;;  %933 = vadd.xlane.f32.xlu1 %v932_v63 }
 0x3a5   :  { %1901 = vmatprep.mubr.msk.f32.mxu1 %vm2013_vm1, %v2012_v13  ;;  %1909 = vmatprep.subr.mxu1 %v2012_v13 }
 0x3a7   :  { %1902 = vmatmul.mubr.msk.f32.vlgmr.msra.gmra.mxu1 %vm347_vm2, %v1969_v1 }
 0x3a8   :  { %1910 = vmatpush3.msra.mxu1 %v2260_v33  ;;  %1911 = vmatprep.mubr.msk.f32.mxu1 %vm2013_vm1, %v2012_v13 }
 0x3a9   :  { %1919 = vmatprep.subr.mxu1 %v2012_v13 }
 0x3ab   :  { %1912 = vmatmul.mubr.msk.f32.vlgmr.msra.gmra.mxu1 %vm347_vm2, %v2296_v3 }
 0x3ac   :  { %1920 = vmatpush3.msra.mxu1 %v1289_v4  ;;  %1921 = vmatprep.mubr.msk.f32.mxu1 %vm2013_vm1, %v2012_v13 }
 0x3ad   :  { %1929 = vmatprep.subr.mxu1 %v2012_v13 }
 0x3af   :  { %1922 = vmatmul.mubr.msk.f32.vlgmr.msra.gmra.mxu1 %vm347_vm2, %v1959_v40 }
 0x3b0   :  { %1930 = vmatpush3.msra.mxu1 %v1457_v5  ;;  %1931 = vmatprep.mubr.msk.f32.mxu1 %vm2013_vm1, %v2012_v13 }
 0x3b1   :  { %1939 = vmatprep.subr.mxu1 %v2012_v13 }
 0x3b2   :  { %v2311_v7 = vpop.xlane.xlu0 %431 }
 0x3b3   :  { %1932 = vmatmul.mubr.msk.f32.vlgmr.msra.gmra.mxu1 %vm347_vm2, %v1963_v53 }
 0x3b4   :  { %1940 = vmatpush3.msra.mxu1 %v1625_v6  ;;  %1941 = vmatprep.mubr.msk.f32.mxu1 %vm2013_vm1, %v2012_v13 }
 0x3b6   :  { %v1282_v8 = vpop.xlane.xlu0 %1281 }
 0x3b7   :  { %1942 = vmatmul.mubr.msk.f32.vlgmr.msra.gmra.mxu1 %vm347_vm2, %v1965_v57 }
 0x3ba   :  { %v766_v10 = vpop.xlane.xlu0 %765 }
 0x41a   :  { %v1451_v14 = vpop.xlane.xlu0 %1450 }
 0x41e   :  { %v1619_v19 = vpop.xlane.xlu0 %1618 }
 0x429   :  { %v597_v9 = vpop.xlane.xlu1 %596 }
 0x42a   :  { %1972 = vrcp.f32 %v597_v9 }
 0x42b   :  { %1974 = vrcp.f32 %v766_v10 }
 0x42d   :  { %v934_v11 = vpop.xlane.xlu1 %933 }
 0x42e   :  { %1976 = vrcp.f32 %v934_v11 }
 0x42f   :  { %1978 = vrcp.f32 %v1282_v8 }
 0x430   :  { %1980 = vrcp.f32 %v1451_v14 }
 0x431   :  { %1982 = vrcp.f32 %v1619_v19 }
 0x432   :  { %1984 = vrcp.f32 %v2311_v7 }
 0x437   :  { %v1973_v12 = vpop.eup %1972 }
 0x438   :  { %v599_v15 = vmul.f32 %v1973_v12, %v597_v9  ;;  %v1975_v16 = vpop.eup %1974 }
 0x439   :  { %v768_v17 = vmul.f32 %v1975_v16, %v766_v10 }
 0x43a   :  { %v600_v18 = vsub.f32 2.0, %v599_v15 }
 0x43b   :  { %v1977_v13 = vpop.eup %1976  ;;  %v769_v20 = vsub.f32 2.0, %v768_v17 }
 0x43c   :  { %v936_v21 = vmul.f32 %v1977_v13, %v934_v11  ;;  %v601_v22 = vmul.f32 %v1973_v12, %v600_v18  ;;  %v1979_v29 = vpop.eup %1978 }
 0x43d   :  { %v770_v28 = vmul.f32 %v1975_v16, %v769_v20  ;;  %v1284_v34 = vmul.f32 %v1979_v29, %v1282_v8  ;;  %v1981_v36 = vpop.eup %1980 }
 0x43e   :  { %v937_v27 = vsub.f32 2.0, %v936_v21  ;;  %v1453_v40 = vmul.f32 %v1981_v36, %v1451_v14  ;;  %v1983_v41 = vpop.eup %1982 }
 0x43f   :  { %v1285_v31 = vsub.f32 2.0, %v1284_v34  ;;  %v1621_v45 = vmul.f32 %v1983_v41, %v1619_v19  ;;  %v1985_v61 = vpop.eup %1984 }
 0x440   :  { %v938_v35 = vmul.f32 %v1977_v13, %v937_v27  ;;  %v1454_v44 = vsub.f32 2.0, %v1453_v40  ;;  %v434_v58 = vmul.f32 %v1985_v61, %v2311_v7 }
 0x441   :  { %v1286_v46 = vmul.f32 %v1979_v29, %v1285_v31  ;;  %v1622_v50 = vsub.f32 2.0, %v1621_v45 }
 0x442   :  { %v1455_v51 = vmul.f32 %v1981_v36, %v1454_v44  ;;  %v435_v62 = vsub.f32 2.0, %v434_v58 }
 0x443   :  { %v1623_v55 = vmul.f32 %v1983_v41, %v1622_v50 }
 0x444   :  { %v436_v0 = vmul.f32 %v1985_v61, %v435_v62 }
 0x446   :  { %v510_v2 = vmul.f32 %v2254_v26, %v436_v0 }
 0x45f   :  { %v675_v23 = vpop.f32.mrf.mxu1 }
 0x460   :  { %v679_v24 = vmul.f32 %v675_v23, %v601_v22 }
 0x461   :  { %v1883_v25 = vpop.f32.mrf.mxu1 }
 0x462   :  { %1017 = vrot.lane.b32.xlu1 %v679_v24, %s2017_s5 }
 0x463   :  { %v843_v30 = vpop.f32.mrf.mxu1 }
 0x464   :  { %v847_v32 = vmul.f32 %v843_v30, %v770_v28 }
 0x465   :  { %v1893_v33 = vpop.f32.mrf.mxu1 }
 0x466   :  { %1021 = vrot.lane.b32.xlu0 %v847_v32, %s2018_s13 }
 0x467   :  { %v1011_v37 = vpop.f32.mrf.mxu1 }
 0x468   :  { %v1015_v38 = vmul.f32 %v1011_v37, %v938_v35 }
 0x469   :  { %v1903_v39 = vpop.f32.mrf.mxu1 }
 0x46a   :  { %1025 = vrot.lane.b32.xlu1 %v1015_v38, %s2019_s14 }
 0x46b   :  { %v1191_v42 = vpop.f32.mrf.mxu1 }
 0x46d   :  { %v1913_v43 = vpop.f32.mrf.mxu1 }
 0x46f   :  { %v1360_v47 = vpop.f32.mrf.mxu1 }
 0x470   :  { %v1364_v48 = vmul.f32 %v1360_v47, %v1286_v46 }
 0x471   :  { %v1923_v49 = vpop.f32.mrf.mxu1 }
 0x472   :  { %1702 = vrot.lane.b32.xlu0 %v1364_v48, %s2017_s5 }
 0x473   :  { %v1528_v52 = vpop.f32.mrf.mxu1 }
 0x474   :  { %v1532_v53 = vmul.f32 %v1528_v52, %v1455_v51 }
 0x475   :  { %v1933_v54 = vpop.f32.mrf.mxu1 }
 0x476   :  { %1706 = vrot.lane.b32.xlu0 %v1532_v53, %s2018_s13 }
 0x477   :  { %v1696_v56 = vpop.f32.mrf.mxu1 }
 0x478   :  { %v1700_v57 = vmul.f32 %v1696_v56, %v1623_v55 }
 0x479   :  { %v1943_v59 = vpop.f32.mrf.mxu1 }
 0x47a   :  { %1710 = vrot.lane.b32.xlu0 %v1700_v57, %s2019_s14 }
 0x48e   :  { %1116 = vadd.xlane.f32.xlu1 %v1115_v60 }
 0x4d4   :  { %v1018_v1 = vpop.permute.xlu1 %1017 }
 0x4d5   :  { %v1028_v4 = vsel %vm347_vm2, %v510_v2, %v1018_v1 }
 0x4d8   :  { %v1022_v63 = vpop.permute.xlu0 %1021 }
 0x4d9   :  { %v1030_v5 = vsel %vm1029_vm5, %v1028_v4, %v1022_v63 }
 0x4dc   :  { %v1026_v6 = vpop.permute.xlu1 %1025 }
 0x4dd   :  { %v1032_v3 = vsel %vm1031_vm6, %v1030_v5, %v1026_v6 }
 0x4de   :  { %1716 = vst.msk [vmem:[#allocation2] sm:$0xff] %vm49_vm0, %v1032_v3 }
 0x4e4   :  { %v1703_v7 = vpop.permute.xlu0 %1702 }
 0x4e8   :  { %v1707_v12 = vpop.permute.xlu0 %1706 }
 0x4ec   :  { %v1711_v16 = vpop.permute.xlu0 %1710 }
 0x517   :  { %v1117_v8 = vpop.xlane.xlu1 %1116 }
 0x518   :  { %1986 = vrcp.f32 %v1117_v8 }
 0x525   :  { %v1987_v9 = vpop.eup %1986 }
 0x526   :  { %v1119_v10 = vmul.f32 %v1987_v9, %v1117_v8 }
 0x528   :  { %v1120_v11 = vsub.f32 2.0, %v1119_v10 }
 0x52a   :  { %v1121_v26 = vmul.f32 %v1987_v9, %v1120_v11 }
 0x52c   :  { %v1195_v14 = vmul.f32 %v1191_v42, %v1121_v26 }
 0x52e   :  { %v1713_v15 = vsel %vm347_vm2, %v1195_v14, %v1703_v7 }
 0x52f   :  { %v1714_v17 = vsel %vm1029_vm5, %v1713_v15, %v1707_v12 }
 0x530   :  { %v1715_v18 = vsel %vm1031_vm6, %v1714_v17, %v1711_v16 }
 0x531   :  { %1717 = vst.msk [vmem:[#allocation2 + $0x8] sm:$0xff] %vm49_vm0, %v1715_v18 }
 0x532   :  { %1999 = shalt.err (!%p1996_p4)
}
 0x533   :  { %s2021_s18 = smov 128  }
 0x534   :  { %1729 = dma.vmem_to_hbm [thread:$0]  %s1724_s16, 256, %s2338_s6, [#allocation3], %s2021_s18, %s2021_s18, %s2017_s5  }
 0x535   :  { %2008 = dma.done.wait [#allocation3], 256  }
 0x536   :  { %2009 = vsyncadd [#allocation3], 4294967040 }
 0x537   :  { %1733 = vsyncpa [#allocation3], 1 }

</bundles_post_ra>
